<compile_context>
chip_gen: v7x
topology: tpu7x:2x2x1
jax: 0.10.0
libtpu: 0.0.40
codegen_flags: <defaults>
</compile_context>

<pallas_src>
import functools

import jax
import jax.numpy as jnp
from jax import lax
from jax.experimental import pallas as pl
from jax.experimental.pallas import tpu as pltpu

_LANE = 128
_MAX_BLOCK_ROWS = 2048   # f32: 1 MiB per block; (in+out) x double-buffer ~= 4 MiB VMEM

# lowbias32-style mixing constants, expressed as wrapped int32 values.
_GOLDEN = -1640531527    # 0x9E3779B9
_MIX1 = 569420461        # 0x21F0AAAD
_MIX2 = 1935289751       # 0x735A2D97
_INT32_MIN = -(1 << 31)


def _dropout_kernel(seed_ref, x_ref, o_ref, *, block_rows, threshold, scale):
    """Inverted dropout on one (block_rows, 128) tile.

    Randomness: counter-based hash of (seed, global element index).  All ops are
    int32 (mul wraps, logical shift emulated with arithmetic-shift + mask), so
    lowering is safe on Mosaic and in interpret mode.
    """
    shape = x_ref.shape
    row = lax.broadcasted_iota(jnp.int32, shape, 0)
    col = lax.broadcasted_iota(jnp.int32, shape, 1)
    base = pl.program_id(0) * block_rows
    gidx = (base + row) * shape[1] + col          # global element index (wrap is harmless)

    # Mix the seed multiplicatively so consecutive seeds give unrelated streams.
    z = gidx ^ (seed_ref[0] * jnp.int32(_GOLDEN))
    # lowbias32 finalizer; (z >> k) & mask == logical right shift on int32 bits.
    z = z ^ ((z >> 16) & jnp.int32(0xFFFF))
    z = z * jnp.int32(_MIX1)
    z = z ^ ((z >> 15) & jnp.int32(0x1FFFF))
    z = z * jnp.int32(_MIX2)
    z = z ^ ((z >> 16) & jnp.int32(0xFFFF))

    # keep  <=>  uint32(z) >= threshold.  Done as a signed compare after an
    # order-preserving sign-bit flip (avoids unsigned compares entirely).
    keep = (z ^ jnp.int32(_INT32_MIN)) >= jnp.int32(threshold - (1 << 31))

    x = x_ref[...]
    o_ref[...] = jnp.where(keep, x * jnp.asarray(scale, dtype=x.dtype),
                           jnp.zeros_like(x))


@functools.partial(jax.jit, static_argnames=("p", "training"))
def _dropout_pallas(x, seed, *, p, training):
    p = float(p)
    if (not training) or p == 0.0:
        return x
    if p >= 1.0:
        return jnp.zeros_like(x)

    orig_shape = x.shape
    dtype = x.dtype
    n = x.size

    flat = x.reshape(-1)
    # Pad only up to a lane multiple (typically a no-op); row tail is handled
    # by the grid's partial last block.
    n_lanes = ((n + _LANE - 1) // _LANE) * _LANE
    padded = n_lanes != n
    if padded:
        flat = jnp.pad(flat, (0, n_lanes - n))
    m = n_lanes // _LANE
    x2 = flat.reshape(m, _LANE)

    if m <= _MAX_BLOCK_ROWS:
        block_rows = m                    # full array dim: no (8,128) requirement
    else:
        block_rows = _MAX_BLOCK_ROWS      # multiple of 32 -> fine for all dtypes
    grid = (pl.cdiv(m, block_rows),)

    # Bake static p into integer threshold + scale constants.
    threshold = min(int(round(p * (1 << 32))), (1 << 32) - 1)
    scale = 1.0 / (1.0 - p)

    kernel = functools.partial(_dropout_kernel, block_rows=block_rows,
                               threshold=threshold, scale=scale)

    seed_arr = jnp.asarray([seed], jnp.int32)
    itemsize = jnp.dtype(dtype).itemsize

    out2 = pl.pallas_call(
        kernel,
        out_shape=jax.ShapeDtypeStruct((m, _LANE), dtype),
        grid_spec=pl.GridSpec(
            grid=grid,
            in_specs=[
                pl.BlockSpec(memory_space=pltpu.MemorySpace.SMEM),   # seed scalar
                pl.BlockSpec((block_rows, _LANE), lambda i: (i, 0)),
            ],
            out_specs=pl.BlockSpec((block_rows, _LANE), lambda i: (i, 0)),
        ),
        compiler_params=pltpu.CompilerParams(
            dimension_semantics=("parallel",)),      # independent streams per tile
        cost_estimate=pl.CostEstimate(
            flops=2 * n, transcendentals=0, bytes_accessed=2 * n * itemsize),
    )(seed_arr, x2)

    out_flat = out2.reshape(-1)
    if padded:
        out_flat = out_flat[:n]
    return out_flat.reshape(orig_shape)


class Dropout2:
    """JAX/Pallas equivalent of the PyTorch Dropout2 module.

    `p` may be a float (the ScheduledFloat case reduces to float(p) at call
    time; in eval mode ScheduledFloat returns its default)."""

    def __init__(self, p: float):
        self.p = float(p)
        self.training = True

    def eval(self):
        self.training = False
        return self

    def train(self):
        self.training = True
        return self

    def __call__(self, x, seed: int = 0):
        return _dropout_pallas(x, seed, p=self.p, training=self.training)


if __name__ == "__main__":
    import numpy as np

    key = jax.random.PRNGKey(0)
    x = jax.random.normal(key, (2, 4, 16, 16), dtype=jnp.float32)  # NCHW

    p = 0.25
    mod = Dropout2(p)

    # Training mode: dropout applied inside the Pallas kernel.
    y = jax.block_until_ready(mod(x, seed=123))
    assert y.shape == x.shape and y.dtype == x.dtype

    # Surviving elements equal x / (1 - p); dropped elements are exactly 0.
    scale = 1.0 / (1.0 - p)
    mask = np.asarray(y) != 0.0
    np.testing.assert_allclose(np.asarray(y)[mask],
                               np.asarray(x * scale)[mask],
                               rtol=1e-6, atol=1e-6)
    drop_frac = 1.0 - float(mask.mean())
    assert 0.05 < drop_frac < 0.55, f"unexpected drop fraction {drop_frac}"

    # Different seeds give different masks.
    y2 = jax.block_until_ready(mod(x, seed=124))
    assert bool(jnp.any((y2 == 0.0) != (y == 0.0)))

    # Eval mode: identity.
    y_eval = jax.block_until_ready(mod.eval()(x))
    np.testing.assert_array_equal(np.asarray(y_eval), np.asarray(x))

    print("KERNEL_OK")
</pallas_src>

<mosaic_0001>
module attributes {stable_mosaic.version = 11 : i64} {
  func.func @_dropout_kernel(%arg0: i32, %arg1: memref<1xi32, #tpu.memory_space<smem>>, %arg2: memref<16x128xf32, #tpu.memory_space<vmem>>, %arg3: memref<16x128xf32, #tpu.memory_space<vmem>>) attributes {dimension_semantics = [#tpu.dimension_semantics<parallel>], iteration_bounds = array<i64: 1>, scalar_prefetch = 0 : i64, scratch_operands = 0 : i64, tpu.core_type = #tpu.core_type<tc>, window_params = [{transform_indices = @transform_0, window_bounds = array<i64: 1>}, {transform_indices = @transform_1, window_bounds = array<i64: 16, 128>}, {transform_indices = @transform_2, window_bounds = array<i64: 16, 128>}]} {
    %0 = tpu.iota {dimensions = array<i32: 0>} : vector<16x128xi32>
    %1 = tpu.iota {dimensions = array<i32: 1>} : vector<16x128xi32>
    %c16_i32 = arith.constant 16 : i32
    %2 = arith.muli %arg0, %c16_i32 : i32
    %3 = vector.broadcast %2 : i32 to vector<16x128xi32>
    %4 = arith.addi %3, %0 : vector<16x128xi32>
    %c128_i32 = arith.constant 128 : i32
    %5 = vector.broadcast %c128_i32 : i32 to vector<16x128xi32>
    %6 = arith.muli %4, %5 : vector<16x128xi32>
    %7 = arith.addi %6, %1 : vector<16x128xi32>
    %c0 = arith.constant 0 : index
    %8 = memref.load %arg1[%c0] : memref<1xi32, #tpu.memory_space<smem>>
    %c-1640531527_i32 = arith.constant -1640531527 : i32
    %9 = arith.muli %8, %c-1640531527_i32 : i32
    %10 = vector.broadcast %9 : i32 to vector<16x128xi32>
    %11 = arith.xori %7, %10 : vector<16x128xi32>
    %c16_i32_0 = arith.constant 16 : i32
    %12 = vector.broadcast %c16_i32_0 : i32 to vector<16x128xi32>
    %13 = arith.shrsi %11, %12 : vector<16x128xi32>
    %c65535_i32 = arith.constant 65535 : i32
    %14 = vector.broadcast %c65535_i32 : i32 to vector<16x128xi32>
    %15 = arith.andi %13, %14 : vector<16x128xi32>
    %16 = arith.xori %11, %15 : vector<16x128xi32>
    %c569420461_i32 = arith.constant 569420461 : i32
    %17 = vector.broadcast %c569420461_i32 : i32 to vector<16x128xi32>
    %18 = arith.muli %16, %17 : vector<16x128xi32>
    %c15_i32 = arith.constant 15 : i32
    %19 = vector.broadcast %c15_i32 : i32 to vector<16x128xi32>
    %20 = arith.shrsi %18, %19 : vector<16x128xi32>
    %c131071_i32 = arith.constant 131071 : i32
    %21 = vector.broadcast %c131071_i32 : i32 to vector<16x128xi32>
    %22 = arith.andi %20, %21 : vector<16x128xi32>
    %23 = arith.xori %18, %22 : vector<16x128xi32>
    %c1935289751_i32 = arith.constant 1935289751 : i32
    %24 = vector.broadcast %c1935289751_i32 : i32 to vector<16x128xi32>
    %25 = arith.muli %23, %24 : vector<16x128xi32>
    %c16_i32_1 = arith.constant 16 : i32
    %26 = vector.broadcast %c16_i32_1 : i32 to vector<16x128xi32>
    %27 = arith.shrsi %25, %26 : vector<16x128xi32>
    %c65535_i32_2 = arith.constant 65535 : i32
    %28 = vector.broadcast %c65535_i32_2 : i32 to vector<16x128xi32>
    %29 = arith.andi %27, %28 : vector<16x128xi32>
    %30 = arith.xori %25, %29 : vector<16x128xi32>
    %c-2147483648_i32 = arith.constant -2147483648 : i32
    %31 = vector.broadcast %c-2147483648_i32 : i32 to vector<16x128xi32>
    %32 = arith.xori %30, %31 : vector<16x128xi32>
    %c-1073741824_i32 = arith.constant -1073741824 : i32
    %33 = vector.broadcast %c-1073741824_i32 : i32 to vector<16x128xi32>
    %34 = arith.cmpi sge, %32, %33 : vector<16x128xi32>
    %c0_3 = arith.constant 0 : index
    %c0_4 = arith.constant 0 : index
    %35 = vector.load %arg2[%c0_3, %c0_4] : memref<16x128xf32, #tpu.memory_space<vmem>>, vector<16x128xf32>
    %cst = arith.constant 1.33333337 : f32
    %36 = vector.broadcast %cst : f32 to vector<16x128xf32>
    %37 = arith.mulf %35, %36 : vector<16x128xf32>
    %cst_5 = arith.constant 0.000000e+00 : f32
    %38 = vector.broadcast %cst_5 : f32 to vector<16x128xf32>
    %39 = arith.select %34, %37, %38 : vector<16x128xi1>, vector<16x128xf32>
    %c0_6 = arith.constant 0 : index
    %c0_7 = arith.constant 0 : index
    %40 = vector.load %arg3[%c0_6, %c0_7] : memref<16x128xf32, #tpu.memory_space<vmem>>, vector<16x128xf32>
    tpu.vector_store %arg3[%c0_6, %c0_7], %39 {strides = array<i32>} : memref<16x128xf32, #tpu.memory_space<vmem>>, vector<16x128xf32>,
    return
  }
  func.func @transform_0(%arg0: i32) -> i32 {
    %c0_i32 = arith.constant 0 : i32
    %c0_i32_0 = arith.constant 0 : i32
    return %c0_i32 : i32
  }
  func.func @transform_1(%arg0: i32) -> (i32, i32) {
    %c0_i32 = arith.constant 0 : i32
    %c0_i32_0 = arith.constant 0 : i32
    return %arg0, %c0_i32 : i32, i32
  }
  func.func @transform_2(%arg0: i32) -> (i32, i32) {
    %c0_i32 = arith.constant 0 : i32
    %c0_i32_0 = arith.constant 0 : i32
    return %arg0, %c0_i32 : i32, i32
  }
}

</mosaic_0001>

<bundles_post_ra>
// kernel: _dropout_pallas.1
= control target key start
LH: loop header
LB: loop body
LE: loop exit
PB: predicated region body
PF: predicated region fallthrough
CT: control target
= control target key end

     0   :  { %v12_v0 = vlaneseq  ;;  %s104_s0 = inlined_call_operand.<no memory space> [shape: s32[1], index: 0, kind: input, shape index: {}]   ;;  %s105_s1 = inlined_call_operand.vmem [shape: f32[16,128], index: 1, kind: input, shape index: {}]   ;;  %s106_s2 = inlined_call_operand.vmem [shape: f32[16,128], index: 2, kind: output, shape index: {}]  }
   0x1   :  { %s26_s11 = smul.u32 2654435769, %s104_s0  ;;  %v56_v23 = vld [vmem:[%s105_s1] sm:$0xff]  ;;  %v57_v27 = vld [vmem:[%s105_s1 + $0x8] sm:$0xff] }
   0x2   :  { %v13_v1 = vshrl.u32 %v12_v0, 7  ;;  %v16_v2 = vand.u32 127, %v12_v0  ;;  %v58_v28 = vmul.f32 1.3333334, %v56_v23  ;;  %v59_v31 = vmul.f32 1.3333334, %v57_v27 }
   0x3   :  { %v27_v5 = vstv %s26_s11 }
   0x4   :  { %v21_v3 = vmul.u32 128, %v13_v1  ;;  %v14_v4 = vadd.s32 8, %v13_v1 }
   0x6   :  { %v23_v6 = vadd.s32 %v21_v3, %v16_v2  ;;  %v22_v7 = vmul.u32 128, %v14_v4 }
   0x8   :  { %v28_v8 = vxor.u32 %v27_v5, %v23_v6  ;;  %v24_v9 = vadd.s32 %v22_v7, %v16_v2 }
   0xa   :  { %v68_v10 = vshrl.u32 %v28_v8, 16  ;;  %v29_v11 = vxor.u32 %v27_v5, %v24_v9 }
   0xc   :  { %v34_v12 = vxor.u32 %v68_v10, %v28_v8  ;;  %v69_v13 = vshrl.u32 %v29_v11, 16 }
   0xe   :  { %v36_v14 = vmul.u32 569420461, %v34_v12  ;;  %v35_v15 = vxor.u32 %v69_v13, %v29_v11 }
  0x10   :  { %v70_v16 = vshrl.u32 %v36_v14, 15  ;;  %v37_v17 = vmul.u32 569420461, %v35_v15 }
  0x12   :  { %v42_v18 = vxor.u32 %v70_v16, %v36_v14  ;;  %v71_v19 = vshrl.u32 %v37_v17, 15 }
  0x14   :  { %v44_v20 = vmul.u32 1935289751, %v42_v18  ;;  %v43_v21 = vxor.u32 %v71_v19, %v37_v17 }
  0x16   :  { %v72_v22 = vshrl.u32 %v44_v20, 16  ;;  %v45_v24 = vmul.u32 1935289751, %v43_v21 }
  0x18   :  { %v50_v25 = vxor.u32 %v72_v22, %v44_v20  ;;  %v73_v26 = vshrl.u32 %v45_v24, 16 }
  0x1a   :  { %v52_v29 = vxor.u32 2147483648, %v50_v25  ;;  %v51_v30 = vxor.u32 %v73_v26, %v45_v24 }
  0x1c   :  { %vm54_vm0 = vcmp.ge.s32.totalorder %v52_v29, 3221225472  ;;  %v53_v32 = vxor.u32 2147483648, %v51_v30 }
  0x1d   :  { %v60_v33 = vsel %vm54_vm0, %v58_v28, 0.0 }
  0x1e   :  { %62 = vst [vmem:[%s106_s2] sm:$0xff] %v60_v33  ;;  %vm55_vm1 = vcmp.ge.s32.totalorder %v53_v32, 3221225472 }
  0x1f   :  { %v61_v34 = vsel %vm55_vm1, %v59_v31, 0.0 }
  0x20   :  { %63 = vst [vmem:[%s106_s2 + $0x8] sm:$0xff] %v61_v34 }

</bundles_post_ra>
